<compile_context>
chip_gen: v5e
topology: v5e:2x2
jax: 0.10.0
libtpu: 0.0.40
codegen_flags: <defaults>
</compile_context>

<pallas_src>
import functools
import math

import jax
import jax.numpy as jnp
from jax.experimental import pallas as pl
from jax.experimental.pallas import tpu as pltpu


def _round_up(x: int, m: int) -> int:
    return ((x + m - 1) // m) * m


# ----------------------------------------------------------------------------
# Kernel: one row-tile of the *entire* MLP (all layers fused).
#   x_ref : (TM, Dp)    bf16   row tile of the (padded) input
#   w_ref : (L, Dp, Dp) bf16   all layer weights, resident in VMEM
#   b_ref : (L, 1, Dp)  f32    all layer biases, resident in VMEM
#   o_ref : (TM, Dp)    f32    row tile of the output
# ----------------------------------------------------------------------------
def _mlp_fused_kernel(num_layers, x_ref, w_ref, b_ref, o_ref):
    h = x_ref[...]                                    # bf16 (TM, Dp)
    acc = None
    for l in range(num_layers):                       # static unroll (L is small)
        acc = jnp.dot(h, w_ref[l],                    # MXU: bf16 x bf16 -> f32
                      preferred_element_type=jnp.float32)
        acc = jnp.maximum(acc + b_ref[l], 0.0)        # f32 bias + ReLU (VPU)
        h = acc.astype(jnp.bfloat16)                  # bf16 operand for next MXU
    o_ref[...] = acc.astype(o_ref.dtype)


# ----------------------------------------------------------------------------
# Wrapper: pad to TPU-friendly shapes, launch a single fused pallas_call.
#   x       : (..., hidden)
#   weights : list of (hidden, hidden)  (already in x @ W layout)
#   biases  : list of (hidden,)
# ----------------------------------------------------------------------------
def mlp_forward(x, weights, biases, *, tm_max=256):
    assert len(weights) == len(biases) and len(weights) >= 1
    L = len(weights)
    orig_shape = x.shape
    hidden = orig_shape[-1]
    M = int(math.prod(orig_shape[:-1]))

    # Lane/sublane-friendly padded sizes.
    Dp = _round_up(max(hidden, 128), 128)             # lane-dense K and output N
    TM = min(tm_max, _round_up(M, 8))                 # row tile, multiple of 8
    M_pad = _round_up(M, TM)

    # Zero-pad: padded feature columns of x / weight rows+cols / bias entries are
    # all zero, so padded output columns are relu(0 + 0) = 0 and padding is
    # self-consistent across layers.  Padded rows are sliced off at the end.
    x2 = x.reshape(M, hidden).astype(jnp.bfloat16)
    x_p = jnp.zeros((M_pad, Dp), jnp.bfloat16).at[:M, :hidden].set(x2)
    w_stack = jnp.stack(list(weights)).astype(jnp.bfloat16)       # (L, h, h)
    w_p = jnp.zeros((L, Dp, Dp), jnp.bfloat16).at[:, :hidden, :hidden].set(w_stack)
    b_stack = jnp.stack(list(biases)).astype(jnp.float32)         # (L, h)
    b_p = jnp.zeros((L, 1, Dp), jnp.float32).at[:, 0, :hidden].set(b_stack)

    grid = (M_pad // TM,)
    kernel = functools.partial(_mlp_fused_kernel, L)

    out = pl.pallas_call(
        kernel,
        out_shape=jax.ShapeDtypeStruct((M_pad, Dp), jnp.float32),
        grid_spec=pltpu.PrefetchScalarGridSpec(
            num_scalar_prefetch=0,
            grid=grid,
            in_specs=[
                pl.BlockSpec((TM, Dp), lambda i: (i, 0)),          # row tiles
                pl.BlockSpec((L, Dp, Dp), lambda i: (0, 0, 0)),    # resident W
                pl.BlockSpec((L, 1, Dp), lambda i: (0, 0, 0)),     # resident b
            ],
            out_specs=pl.BlockSpec((TM, Dp), lambda i: (i, 0)),
        ),
        compiler_params=pltpu.CompilerParams(
            dimension_semantics=("parallel",),        # megacore-friendly on v7x
            vmem_limit_bytes=32 * 1024 * 1024,        # fits v7x's smaller VMEM
        ),
        cost_estimate=pl.CostEstimate(
            flops=2 * M_pad * Dp * Dp * L,
            transcendentals=0,
            bytes_accessed=(M_pad * Dp * 2            # x (bf16)
                            + M_pad * Dp * 4          # out (f32)
                            + L * Dp * Dp * 2         # weights (bf16)
                            + L * Dp * 4),            # biases (f32)
        ),
    )(x_p, w_p, b_p)

    return out[:M, :hidden].reshape(orig_shape)


# ----------------------------------------------------------------------------
# References for correctness checks.
# ----------------------------------------------------------------------------
def mlp_ref_bf16(x, weights, biases):
    """Same numerics as the kernel: bf16 operands, f32 accumulation."""
    M = int(math.prod(x.shape[:-1]))
    h = x.reshape(M, x.shape[-1]).astype(jnp.bfloat16)
    out = None
    for w, b in zip(weights, biases):
        acc = jnp.dot(h, w.astype(jnp.bfloat16),
                      preferred_element_type=jnp.float32)
        out = jnp.maximum(acc + b.astype(jnp.float32), 0.0)
        h = out.astype(jnp.bfloat16)
    return out.reshape(x.shape)


def mlp_ref_f32(x, weights, biases):
    """Full-f32 reference (matches the torch module's math)."""
    y = x
    for w, b in zip(weights, biases):
        y = jnp.maximum(y @ w + b, 0.0)
    return y


# ----------------------------------------------------------------------------
# Deterministic synthetic parameters (shapes implied by the module config).
# Weights are stored in (in, out) layout, i.e. Linear(x) == x @ W + b.
# ----------------------------------------------------------------------------
def init_params(key, *, hidden, num_layers):
    weights, biases = [], []
    for _ in range(num_layers):
        key, kw, kb = jax.random.split(key, 3)
        w = jax.random.normal(kw, (hidden, hidden), jnp.float32)
        w = w * (2.0 / hidden) ** 0.5
        b = 0.01 * jax.random.normal(kb, (hidden,), jnp.float32)
        weights.append(w)
        biases.append(b)
    return weights, biases


if __name__ == "__main__":
    BATCH, SEQ, HIDDEN = 2, 8, 32
    NUM_LAYERS = 3

    key = jax.random.PRNGKey(0)
    key, kx = jax.random.split(key)
    x = jax.random.normal(kx, (BATCH, SEQ, HIDDEN), jnp.float32)
    weights, biases = init_params(key, hidden=HIDDEN, num_layers=NUM_LAYERS)

    out = jax.block_until_ready(mlp_forward(x, weights, biases))
    assert out.shape == (BATCH, SEQ, HIDDEN), out.shape

    # Tight check against a reference with identical (bf16-operand) numerics.
    ref_b = jax.block_until_ready(mlp_ref_bf16(x, weights, biases))
    assert jnp.allclose(out, ref_b, atol=1e-4, rtol=1e-4), (
        "Pallas output mismatch vs bf16-emulated reference"
    )

    # Loose sanity check against the full-f32 torch-equivalent math.
    ref_f = jax.block_until_ready(mlp_ref_f32(x, weights, biases))
    assert jnp.allclose(out, ref_f, atol=0.1, rtol=0.1), (
        "Pallas output too far from f32 reference"
    )

    print("KERNEL_OK")
</pallas_src>

<mosaic_0001>
module attributes {stable_mosaic.version = 11 : i64} {
  func.func @_mlp_fused_kernel(%arg0: i32, %arg1: memref<16x128xbf16, #tpu.memory_space<vmem>>, %arg2: memref<3x128x128xbf16, #tpu.memory_space<vmem>>, %arg3: memref<3x1x128xf32, #tpu.memory_space<vmem>>, %arg4: memref<16x128xf32, #tpu.memory_space<vmem>>) attributes {dimension_semantics = [#tpu.dimension_semantics<parallel>], iteration_bounds = array<i64: 1>, scalar_prefetch = 0 : i64, scratch_operands = 0 : i64, tpu.core_type = #tpu.core_type<tc>, window_params = [{transform_indices = @transform_0, window_bounds = array<i64: 16, 128>}, {pipeline_mode = #tpu.pipeline_mode<synchronous>, transform_indices = @transform_1, window_bounds = array<i64: 3, 128, 128>}, {pipeline_mode = #tpu.pipeline_mode<synchronous>, transform_indices = @transform_2, window_bounds = array<i64: 3, 1, 128>}, {transform_indices = @transform_3, window_bounds = array<i64: 16, 128>}]} {
    %c0 = arith.constant 0 : index
    %c0_0 = arith.constant 0 : index
    %0 = vector.load %arg1[%c0, %c0_0] : memref<16x128xbf16, #tpu.memory_space<vmem>>, vector<16x128xbf16>
    %c0_1 = arith.constant 0 : index
    %c0_2 = arith.constant 0 : index
    %c0_3 = arith.constant 0 : index
    %1 = vector.load %arg2[%c0_1, %c0_2, %c0_3] : memref<3x128x128xbf16, #tpu.memory_space<vmem>>, vector<1x128x128xbf16>
    %2 = vector.shape_cast %1 : vector<1x128x128xbf16> to vector<128x128xbf16>
    %cst = arith.constant dense<0.000000e+00> : vector<16x128xf32>
    %3 = tpu.matmul %0, %2, %cst {dimension_numbers = #tpu.dot_dimension_numbers<[1], [0], [0], [1], [0, 0, 1, 1], [], []>} : vector<16x128xbf16>, vector<128x128xbf16>, vector<16x128xf32> -> vector<16x128xf32>
    %c0_4 = arith.constant 0 : index
    %c0_5 = arith.constant 0 : index
    %c0_6 = arith.constant 0 : index
    %4 = vector.load %arg3[%c0_4, %c0_5, %c0_6] : memref<3x1x128xf32, #tpu.memory_space<vmem>>, vector<1x1x128xf32>
    %5 = vector.shape_cast %4 : vector<1x1x128xf32> to vector<1x128xf32>
    %6 = vector.broadcast %5 : vector<1x128xf32> to vector<16x128xf32>
    %7 = arith.addf %3, %6 : vector<16x128xf32>
    %cst_7 = arith.constant 0.000000e+00 : f32
    %8 = vector.broadcast %cst_7 : f32 to vector<16x128xf32>
    %9 = arith.maximumf %7, %8 : vector<16x128xf32>
    %10 = arith.truncf %9 : vector<16x128xf32> to vector<16x128xbf16>
    %c1 = arith.constant 1 : index
    %c0_8 = arith.constant 0 : index
    %c0_9 = arith.constant 0 : index
    %11 = vector.load %arg2[%c1, %c0_8, %c0_9] : memref<3x128x128xbf16, #tpu.memory_space<vmem>>, vector<1x128x128xbf16>
    %12 = vector.shape_cast %11 : vector<1x128x128xbf16> to vector<128x128xbf16>
    %cst_10 = arith.constant dense<0.000000e+00> : vector<16x128xf32>
    %13 = tpu.matmul %10, %12, %cst_10 {dimension_numbers = #tpu.dot_dimension_numbers<[1], [0], [0], [1], [0, 0, 1, 1], [], []>} : vector<16x128xbf16>, vector<128x128xbf16>, vector<16x128xf32> -> vector<16x128xf32>
    %c1_11 = arith.constant 1 : index
    %c0_12 = arith.constant 0 : index
    %c0_13 = arith.constant 0 : index
    %14 = vector.load %arg3[%c1_11, %c0_12, %c0_13] : memref<3x1x128xf32, #tpu.memory_space<vmem>>, vector<1x1x128xf32>
    %15 = vector.shape_cast %14 : vector<1x1x128xf32> to vector<1x128xf32>
    %16 = vector.broadcast %15 : vector<1x128xf32> to vector<16x128xf32>
    %17 = arith.addf %13, %16 : vector<16x128xf32>
    %cst_14 = arith.constant 0.000000e+00 : f32
    %18 = vector.broadcast %cst_14 : f32 to vector<16x128xf32>
    %19 = arith.maximumf %17, %18 : vector<16x128xf32>
    %20 = arith.truncf %19 : vector<16x128xf32> to vector<16x128xbf16>
    %c2 = arith.constant 2 : index
    %c0_15 = arith.constant 0 : index
    %c0_16 = arith.constant 0 : index
    %21 = vector.load %arg2[%c2, %c0_15, %c0_16] : memref<3x128x128xbf16, #tpu.memory_space<vmem>>, vector<1x128x128xbf16>
    %22 = vector.shape_cast %21 : vector<1x128x128xbf16> to vector<128x128xbf16>
    %cst_17 = arith.constant dense<0.000000e+00> : vector<16x128xf32>
    %23 = tpu.matmul %20, %22, %cst_17 {dimension_numbers = #tpu.dot_dimension_numbers<[1], [0], [0], [1], [0, 0, 1, 1], [], []>} : vector<16x128xbf16>, vector<128x128xbf16>, vector<16x128xf32> -> vector<16x128xf32>
    %c2_18 = arith.constant 2 : index
    %c0_19 = arith.constant 0 : index
    %c0_20 = arith.constant 0 : index
    %24 = vector.load %arg3[%c2_18, %c0_19, %c0_20] : memref<3x1x128xf32, #tpu.memory_space<vmem>>, vector<1x1x128xf32>
    %25 = vector.shape_cast %24 : vector<1x1x128xf32> to vector<1x128xf32>
    %26 = vector.broadcast %25 : vector<1x128xf32> to vector<16x128xf32>
    %27 = arith.addf %23, %26 : vector<16x128xf32>
    %cst_21 = arith.constant 0.000000e+00 : f32
    %28 = vector.broadcast %cst_21 : f32 to vector<16x128xf32>
    %29 = arith.maximumf %27, %28 : vector<16x128xf32>
    %c0_22 = arith.constant 0 : index
    %c0_23 = arith.constant 0 : index
    %30 = vector.load %arg4[%c0_22, %c0_23] : memref<16x128xf32, #tpu.memory_space<vmem>>, vector<16x128xf32>
    tpu.vector_store %arg4[%c0_22, %c0_23], %29 {strides = array<i32>} : memref<16x128xf32, #tpu.memory_space<vmem>>, vector<16x128xf32>,
    return
  }
  func.func @transform_0(%arg0: i32) -> (i32, i32) {
    %c0_i32 = arith.constant 0 : i32
    %c0_i32_0 = arith.constant 0 : i32
    return %arg0, %c0_i32 : i32, i32
  }
  func.func @transform_1(%arg0: i32) -> (i32, i32, i32) {
    %c0_i32 = arith.constant 0 : i32
    %c0_i32_0 = arith.constant 0 : i32
    %c0_i32_1 = arith.constant 0 : i32
    %c0_i32_2 = arith.constant 0 : i32
    return %c0_i32, %c0_i32_0, %c0_i32_1 : i32, i32, i32
  }
  func.func @transform_2(%arg0: i32) -> (i32, i32, i32) {
    %c0_i32 = arith.constant 0 : i32
    %c0_i32_0 = arith.constant 0 : i32
    %c0_i32_1 = arith.constant 0 : i32
    %c0_i32_2 = arith.constant 0 : i32
    return %c0_i32, %c0_i32_0, %c0_i32_1 : i32, i32, i32
  }
  func.func @transform_3(%arg0: i32) -> (i32, i32) {
    %c0_i32 = arith.constant 0 : i32
    %c0_i32_0 = arith.constant 0 : i32
    return %arg0, %c0_i32 : i32, i32
  }
}

</mosaic_0001>

<bundles_post_ra>
// kernel: tpu_custom_call.1
= control target key start
LH: loop header
LB: loop body
LE: loop exit
PB: predicated region body
PF: predicated region fallthrough
CT: control target
= control target key end

     0   :  { %8 = vsyncpa [#allocation3], 0  ;;  %s632_s0 = inlined_call_operand.hbm [shape: bf16[16,128], index: 0, kind: input, shape index: {}]   ;;  %s633_s1 = inlined_call_operand.hbm [shape: bf16[3,128,128], index: 1, kind: input, shape index: {}]   ;;  %s634_s2 = inlined_call_operand.hbm [shape: f32[3,1,128], index: 2, kind: input, shape index: {}]   ;;  %s635_s3 = inlined_call_operand.hbm [shape: f32[16,128], index: 3, kind: output, shape index: {}]  }
   0x1   :  { %9 = vsyncpa [#allocation6], 0 }
   0x2   :  { %10 = vsyncpa [#allocation4], 0  ;;  %s28_s14 = sshll.u32 %s633_s1, 4  ;;  %s590_s15 = smov [#allocation5]   ;;  %s29_s14 = int_to_ptr.hbm [resolvable:$true] %s28_s14 }
   0x3   :  { %s30_s16 = sshll.u32 %s590_s15, 4  ;;  %s15_s19 = sshll.u32 %s632_s0, 4  ;;  %s31_s16 = int_to_ptr.vmem [resolvable:$true] %s30_s16  ;;  %s16_s19 = int_to_ptr.hbm [resolvable:$true] %s15_s19 }
   0x4   :  { %s591_s20 = smov 64   ;;  %s592_s21 = smov 4  }
   0x5   :  { %36 = dma.hbm_to_vmem [thread:$0]  %s29_s14, 3072, %s31_s16, [#allocation6], %s591_s20, %s591_s20, %s592_s21  }
   0x6   :  { %s593_s22 = smov [#allocation2]   ;;  %s41_s26 = sshll.u32 %s634_s2, 4  ;;  %s42_s26 = int_to_ptr.hbm [resolvable:$true] %s41_s26 }
   0x7   :  { %s17_s23 = sshll.u32 %s593_s22, 4  ;;  %s594_s1 = smov [#allocation7]   ;;  %s18_s23 = int_to_ptr.vmem [resolvable:$true] %s17_s23 }
   0x8   :  { %23 = dma.hbm_to_vmem [thread:$0]  %s16_s19, 128, %s18_s23, [#allocation3], %s591_s20, %s591_s20, %s592_s21  }
   0x9   :  { %s43_s27 = sshll.u32 %s594_s1, 4  ;;  %s595_s28 = smov 16   ;;  %s44_s27 = int_to_ptr.vmem [resolvable:$true] %s43_s27 }
   0xa   :  { %s596_s29 = smov 1  }
   0xb   :  { %49 = dma.hbm_to_vmem [thread:$0]  %s42_s26, 48, %s44_s27, [#allocation6], %s595_s28, %s595_s28, %s596_s29  }
   0xc   :  { %584 = dma.done.wait [#allocation3], 128  }
   0xd   :  { %585 = vsyncadd [#allocation3], 4294967168 }
   0xe   :  { %586 = dma.done.wait [#allocation6], 3120  }
   0xf   :  { %587 = vsyncadd [#allocation6], 4294964176  ;;  %v458_v0 = vld [vmem:[#allocation5 + $0x38] sm:$0xff]  ;;  %v457_v1 = vld [vmem:[#allocation5 + $0x30] sm:$0xff]  ;;  %s597_s0 = smov [#allocation8]   ;;  %s336_s5 = sshll.u32 %s635_s3, 4  ;;  %s337_s5 = int_to_ptr.hbm [resolvable:$true] %s336_s5 }
  0x10   :  { %138 = vmatpush.bf16.msra.mxu0 %v458_v0  ;;  %v466_v2 = vld [vmem:[#allocation5 + $0x78] sm:$0xff]  ;;  %v465_v3 = vld [vmem:[#allocation5 + $0x70] sm:$0xff]  ;;  %v456_v4 = vld [vmem:[#allocation5 + $0x28] sm:$0xff]  ;;  %s334_s2 = sshll.u32 %s597_s0, 4  ;;  %s598_s6 = smov 128   ;;  %s335_s2 = int_to_ptr.vmem [resolvable:$true] %s334_s2 }
  0x11   :  { %225 = vmatpush.bf16.msra.mxu1 %v466_v2  ;;  %v464_v5 = vld [vmem:[#allocation5 + $0x68] sm:$0xff]  ;;  %v455_v6 = vld [vmem:[#allocation5 + $0x20] sm:$0xff]  ;;  %v454_v8 = vld [vmem:[#allocation5 + $0x18] sm:$0xff]  ;;  %s599_s7 = smov 8  }
  0x12   :  { %v463_v7 = vld [vmem:[#allocation5 + $0x60] sm:$0xff]  ;;  %v453_v9 = vld [vmem:[#allocation5 + $0x10] sm:$0xff]  ;;  %v452_v10 = vld [vmem:[#allocation5 + $0x8] sm:$0xff] }
  0x13   :  { %v451_v11 = vld [vmem:[#allocation5] sm:$0xff]  ;;  %v450_v12 = vld [vmem:[#allocation2] sm:$0xff]  ;;  %v461_v14 = vld [vmem:[#allocation5 + $0x50] sm:$0xff] }
  0x14   :  { %139 = vmatpush.bf16.msra.mxu0 %v457_v1  ;;  %v462_v13 = vld [vmem:[#allocation5 + $0x58] sm:$0xff]  ;;  %v460_v15 = vld [vmem:[#allocation5 + $0x48] sm:$0xff]  ;;  %v459_v16 = vld [vmem:[#allocation5 + $0x40] sm:$0xff] }
  0x15   :  { %226 = vmatpush.bf16.msra.mxu1 %v465_v3  ;;  %v474_v17 = vld [vmem:[#allocation5 + $0xb8] sm:$0xff]  ;;  %v473_v18 = vld [vmem:[#allocation5 + $0xb0] sm:$0xff]  ;;  %v472_v19 = vld [vmem:[#allocation5 + $0xa8] sm:$0xff] }
  0x16   :  { %312 = vmatpush.bf16.msra.mxu2 %v474_v17  ;;  %v471_v20 = vld [vmem:[#allocation5 + $0xa0] sm:$0xff]  ;;  %v470_v29 = vld [vmem:[#allocation5 + $0x98] sm:$0xff]  ;;  %v469_v30 = vld [vmem:[#allocation5 + $0x90] sm:$0xff] }
  0x17   :  { %v485_v22 = vld [vmem:[#allocation7] ss:$0 sm:$0xff]  ;;  %v468_v31 = vld [vmem:[#allocation5 + $0x88] sm:$0xff]  ;;  %v486_v34 = vld [vmem:[#allocation7 + $0x1] ss:$0 sm:$0xff] }
  0x18   :  { %140 = vmatpush.bf16.msra.mxu0 %v456_v4  ;;  %v467_v32 = vld [vmem:[#allocation5 + $0x80] sm:$0xff] }
  0x19   :  { %227 = vmatpush.bf16.msra.mxu1 %v464_v5  ;;  %v487_v41 = vld [vmem:[#allocation7 + $0x2] ss:$0 sm:$0xff] }
  0x1a   :  { %313 = vmatpush.bf16.msra.mxu2 %v473_v18 }
  0x1c   :  { %141 = vmatpush.bf16.msra.mxu0 %v455_v6 }
  0x1d   :  { %228 = vmatpush.bf16.msra.mxu1 %v463_v7 }
  0x1e   :  { %314 = vmatpush.bf16.msra.mxu2 %v472_v19 }
  0x20   :  { %142 = vmatpush.bf16.msra.mxu0 %v454_v8 }
  0x21   :  { %229 = vmatpush.bf16.msra.mxu1 %v462_v13 }
  0x22   :  { %315 = vmatpush.bf16.msra.mxu2 %v471_v20 }
  0x24   :  { %143 = vmatpush.bf16.msra.mxu0 %v453_v9 }
  0x25   :  { %230 = vmatpush.bf16.msra.mxu1 %v461_v14 }
  0x26   :  { %316 = vmatpush.bf16.msra.mxu2 %v470_v29 }
  0x28   :  { %144 = vmatpush.bf16.msra.mxu0 %v452_v10 }
  0x29   :  { %231 = vmatpush.bf16.msra.mxu1 %v460_v15 }
  0x2a   :  { %317 = vmatpush.bf16.msra.mxu2 %v469_v30 }
  0x2c   :  { %145 = vmatpush.bf16.msra.mxu0 %v451_v11 }
  0x2d   :  { %232 = vmatpush.bf16.msra.mxu1 %v459_v16 }
  0x2e   :  { %318 = vmatpush.bf16.msra.mxu2 %v468_v31 }
  0x2f   :  { %146 = vmatmul.bf16.vlgmr.msra.gmra.mxu0 %v450_v12 }
  0x32   :  { %319 = vmatpush.bf16.msra.mxu2 %v467_v32 }
  0xac   :  { %v147_v21 = vpop.f32.mrf.mxu0 }
  0xad   :  { %v148_v23 = vadd.f32 %v485_v22, %v147_v21 }
  0xaf   :  { %v152_v26 = vmax.f32 %v148_v23, 0.0 }
  0xb4   :  { %v149_v24 = vpop.f32.mrf.mxu0 }
  0xb5   :  { %v150_v25 = vadd.f32 %v485_v22, %v149_v24 }
  0xb7   :  { %v153_v27 = vmax.f32 %v150_v25, 0.0 }
  0xb9   :  { %v154_v28 = vpack.c.bf16 %v153_v27, %v152_v26 }
  0xbb   :  { %233 = vmatmul.bf16.vlgmr.msra.gmra.mxu1 %v154_v28 }
 0x138   :  { %v234_v33 = vpop.f32.mrf.mxu1 }
 0x139   :  { %v235_v35 = vadd.f32 %v486_v34, %v234_v33 }
 0x13b   :  { %v239_v38 = vmax.f32 %v235_v35, 0.0 }
 0x140   :  { %v236_v36 = vpop.f32.mrf.mxu1 }
 0x141   :  { %v237_v37 = vadd.f32 %v486_v34, %v236_v36 }
 0x143   :  { %v240_v39 = vmax.f32 %v237_v37, 0.0 }
 0x145   :  { %v241_v40 = vpack.c.bf16 %v240_v39, %v239_v38 }
 0x147   :  { %320 = vmatmul.bf16.vlgmr.msra.gmra.mxu2 %v241_v40 }
 0x1ca   :  { %v321_v42 = vpop.f32.mrf.mxu2 }
 0x1cb   :  { %v322_v43 = vadd.f32 %v487_v41, %v321_v42 }
 0x1cd   :  { %v326_v44 = vmax.f32 %v322_v43, 0.0 }
 0x1cf   :  { %328 = vst [vmem:[#allocation8] sm:$0xff] %v326_v44 }
 0x1d2   :  { %v323_v45 = vpop.f32.mrf.mxu2 }
 0x1d3   :  { %v324_v46 = vadd.f32 %v487_v41, %v323_v45 }
 0x1d5   :  { %v327_v47 = vmax.f32 %v324_v46, 0.0 }
 0x1d7   :  { %329 = vst [vmem:[#allocation8 + $0x8] sm:$0xff] %v327_v47 }
 0x1d8   :  { %342 = dma.vmem_to_hbm [thread:$0]  %s335_s2, 256, %s337_s5, [#allocation4], %s598_s6, %s598_s6, %s599_s7  }
 0x1d9   :  { %588 = dma.done.wait [#allocation4], 256  }
 0x1da   :  { %589 = vsyncadd [#allocation4], 4294967040 }
 0x1db   :  { %347 = vsyncpa [#allocation3], 1 }
 0x1dc   :  { %348 = vsyncpa [#allocation6], 1 }
 0x1dd   :  { %349 = vsyncpa [#allocation4], 1 }

</bundles_post_ra>
